<compile_context>
chip_gen: v6e
topology: v6e:2x2x1
jax: 0.10.0
libtpu: 0.0.40
codegen_flags: <defaults>
</compile_context>

<pallas_src>
import jax
import jax.numpy as jnp
from jax.experimental import pallas as pl
from jax.experimental.pallas import tpu as pltpu


def _bump_knn_kernel(params_ref, xt_ref, data_ref, dsq_ref, out_ref, acc_ref):
    # params_ref : SMEM (4,)  = [radius, radius^2, decay, decay/radius^2]
    # xt_ref     : VMEM (D, block_b)   query tile, pre-transposed (constant over k)
    # data_ref   : VMEM (block_n, D)   database tile for this reduction step
    # dsq_ref    : VMEM (block_n, 1)   precomputed ||data_j||^2 (padded rows = 1e30)
    # out_ref    : VMEM (1, block_b)   lane-dense bump values
    # acc_ref    : VMEM (1, block_b)   running min of (||d_j||^2 - 2 <d_j, x_i>)
    k = pl.program_id(1)

    @pl.when(k == 0)
    def _():
        acc_ref[...] = jnp.full(acc_ref.shape, jnp.inf, dtype=acc_ref.dtype)

    # MXU: (block_n, D) @ (D, block_b) -> (block_n, block_b) dot products.
    dots = jnp.dot(data_ref[...], xt_ref[...], preferred_element_type=jnp.float32)
    # ||d_j||^2 - 2 <d_j, x_i>   (query norm is constant over j -> added after the min)
    val = dsq_ref[...] - 2.0 * dots
    acc_ref[...] = jnp.minimum(acc_ref[...], jnp.min(val, axis=0, keepdims=True))

    @pl.when(k == pl.num_programs(1) - 1)
    def _():
        radius = params_ref[0]
        r2 = params_ref[1]
        decay = params_ref[2]
        decay_over_r2 = params_ref[3]

        xt = xt_ref[...]
        x_sq = jnp.sum(xt * xt, axis=0, keepdims=True)            # (1, block_b)
        min_d2 = jnp.maximum(acc_ref[...] + x_sq, 0.0)            # min_j ||x - d_j||^2
        dist = jnp.sqrt(min_d2)                                   # faiss .sqrt()
        x2 = dist * dist
        inside = dist < radius                                    # dist >= 0, abs redundant
        safe_den = jnp.where(inside, x2 - r2, -r2)                # never 0 -> no inf/NaN
        # exp(decay/(x2-r2)) / exp(-decay/r2) fused into one transcendental
        bump = jnp.exp(decay / safe_den + decay_over_r2)
        out_ref[...] = jnp.where(inside, bump, 0.0).astype(out_ref.dtype)


def _round_up(a, b):
    return pl.cdiv(a, b) * b


def bump_knn_forward(x, data, radius=1.0, decay=1.0, block_b=256, block_n=512):
    """x: (B, D) queries, data: (N, D) database. Returns (B,) float32."""
    B, D = x.shape
    N, Dd = data.shape
    assert D == Dd

    # Effective tile sizes (shrink for small problems, keep TPU alignment).
    bb = min(block_b, _round_up(B, 128))   # lane-dim tile, multiple of 128
    bn = min(block_n, _round_up(N, 8))     # sublane-dim tile, multiple of 8
    B_pad = _round_up(B, bb)
    N_pad = _round_up(N, bn)

    xf = x.astype(jnp.float32)
    df = data.astype(jnp.float32)

    # Pre-transpose queries once in XLA; pad with zeros (sliced off at the end).
    xt = jnp.zeros((D, B_pad), jnp.float32).at[:, :B].set(xf.T)
    # Pad database rows with zeros; padded rows get a huge norm so they never win the min.
    data_p = jnp.zeros((N_pad, D), jnp.float32).at[:N, :].set(df)
    d_sq = jnp.sum(df * df, axis=-1)
    d_sq_p = jnp.full((N_pad, 1), jnp.float32(1e30), jnp.float32).at[:N, 0].set(d_sq)

    r = jnp.float32(radius)
    dec = jnp.float32(decay)
    r2 = r * r
    params = jnp.stack([r, r2, dec, dec / r2]).astype(jnp.float32)

    nb = B_pad // bb
    nk = N_pad // bn

    out = pl.pallas_call(
        _bump_knn_kernel,
        out_shape=jax.ShapeDtypeStruct((1, B_pad), jnp.float32),
        grid=(nb, nk),
        in_specs=[
            pl.BlockSpec(memory_space=pltpu.MemorySpace.SMEM),        # params
            pl.BlockSpec((D, bb), lambda i, k: (0, i)),               # query tile (constant over k)
            pl.BlockSpec((bn, D), lambda i, k: (k, 0)),               # database tile
            pl.BlockSpec((bn, 1), lambda i, k: (k, 0)),               # hoisted ||data||^2
        ],
        out_specs=pl.BlockSpec((1, bb), lambda i, k: (0, i)),         # lane-dense output
        scratch_shapes=[pltpu.VMEM((1, bb), jnp.float32)],            # running-min accumulator
        compiler_params=pltpu.CompilerParams(
            dimension_semantics=("parallel", "arbitrary"),
            vmem_limit_bytes=48 * 1024 * 1024,
        ),
    )(params, xt, data_p, d_sq_p)

    return out[0, :B]  # matches torch .squeeze()


def _reference(x, data, radius, decay):
    # plain-JAX reference of the same forward pass
    dist2 = jnp.sum((x[:, None, :] - data[None, :, :]) ** 2, axis=-1)
    d = jnp.sqrt(jnp.min(dist2, axis=-1))
    r2 = radius * radius
    val = jnp.exp(decay / (d * d - r2)) / jnp.exp(-decay / r2)
    return jnp.where(jnp.abs(d) < radius, val, 0.0)


if __name__ == "__main__":
    key = jax.random.PRNGKey(0)
    kd, kx = jax.random.split(key)

    N, D, B = 64, 16, 16          # database size, feature dim, batch of queries
    radius, decay = 1.0, 1.0

    # deterministic "trained" database (stands in for the faiss index contents)
    data = jax.random.normal(kd, (N, D), dtype=jnp.float32) * 0.5
    x = jax.random.normal(kx, (B, D), dtype=jnp.float32) * 0.5

    out = bump_knn_forward(x, data, radius=radius, decay=decay)
    jax.block_until_ready(out)

    ref = _reference(x, data, radius, decay)
    assert out.shape == (B,)
    assert jnp.allclose(out, ref, atol=1e-4, rtol=1e-4), (out, ref)

    print("KERNEL_OK")
</pallas_src>

<mosaic_0001>
module attributes {stable_mosaic.version = 11 : i64} {
  func.func @_bump_knn_kernel(%arg0: i32, %arg1: i32, %arg2: memref<4xf32, #tpu.memory_space<smem>>, %arg3: memref<16x128xf32, #tpu.memory_space<vmem>>, %arg4: memref<64x16xf32, #tpu.memory_space<vmem>>, %arg5: memref<64x1xf32, #tpu.memory_space<vmem>>, %arg6: memref<1x128xf32, #tpu.memory_space<vmem>>, %arg7: memref<1x128xf32, #tpu.memory_space<vmem>>) attributes {dimension_semantics = [#tpu.dimension_semantics<parallel>, #tpu.dimension_semantics<arbitrary>], iteration_bounds = array<i64: 1, 1>, scalar_prefetch = 0 : i64, scratch_operands = 1 : i64, tpu.core_type = #tpu.core_type<tc>, window_params = [{transform_indices = @transform_0, window_bounds = array<i64: 4>}, {transform_indices = @transform_1, window_bounds = array<i64: 16, 128>}, {transform_indices = @transform_2, window_bounds = array<i64: 64, 16>}, {transform_indices = @transform_3, window_bounds = array<i64: 64, 1>}, {transform_indices = @transform_4, window_bounds = array<i64: 1, 128>}]} {
    %c0_i32 = arith.constant 0 : i32
    %0 = arith.cmpi eq, %arg1, %c0_i32 : i32
    %1 = arith.extui %0 : i1 to i32
    %c0_i32_0 = arith.constant 0 : i32
    %2 = arith.cmpi ne, %1, %c0_i32_0 : i32
    scf.if %2 {
      %cst_14 = arith.constant 0x7F800000 : f32
      %19 = vector.broadcast %cst_14 : f32 to vector<1x128xf32>
      %c0_15 = arith.constant 0 : index
      %c0_16 = arith.constant 0 : index
      %20 = vector.load %arg7[%c0_15, %c0_16] : memref<1x128xf32, #tpu.memory_space<vmem>>, vector<1x128xf32>
      tpu.vector_store %arg7[%c0_15, %c0_16], %19 {strides = array<i32>} : memref<1x128xf32, #tpu.memory_space<vmem>>, vector<1x128xf32>,
    } else {
    }
    %c0 = arith.constant 0 : index
    %c0_1 = arith.constant 0 : index
    %3 = vector.load %arg4[%c0, %c0_1] : memref<64x16xf32, #tpu.memory_space<vmem>>, vector<64x16xf32>
    %c0_2 = arith.constant 0 : index
    %c0_3 = arith.constant 0 : index
    %4 = vector.load %arg3[%c0_2, %c0_3] : memref<16x128xf32, #tpu.memory_space<vmem>>, vector<16x128xf32>
    %cst = arith.constant dense<0.000000e+00> : vector<64x128xf32>
    %5 = tpu.matmul %3, %4, %cst {dimension_numbers = #tpu.dot_dimension_numbers<[1], [0], [0], [1], [0, 0, 1, 1], [], []>} : vector<64x16xf32>, vector<16x128xf32>, vector<64x128xf32> -> vector<64x128xf32>
    %c0_4 = arith.constant 0 : index
    %c0_5 = arith.constant 0 : index
    %6 = vector.load %arg5[%c0_4, %c0_5] : memref<64x1xf32, #tpu.memory_space<vmem>>, vector<64x1xf32>
    %cst_6 = arith.constant 2.000000e+00 : f32
    %7 = vector.broadcast %cst_6 : f32 to vector<64x128xf32>
    %8 = arith.mulf %7, %5 : vector<64x128xf32>
    %9 = vector.broadcast %6 : vector<64x1xf32> to vector<64x128xf32>
    %10 = arith.subf %9, %8 : vector<64x128xf32>
    %c0_7 = arith.constant 0 : index
    %c0_8 = arith.constant 0 : index
    %11 = vector.load %arg7[%c0_7, %c0_8] : memref<1x128xf32, #tpu.memory_space<vmem>>, vector<1x128xf32>
    %cst_9 = arith.constant dense<0x7F800000> : vector<128xf32>
    %12 = vector.multi_reduction <minimumf>, %10, %cst_9 [0] : vector<64x128xf32> to vector<128xf32>
    %13 = vector.shape_cast %12 : vector<128xf32> to vector<1x128xf32>
    %14 = arith.minimumf %11, %13 : vector<1x128xf32>
    %c0_10 = arith.constant 0 : index
    %c0_11 = arith.constant 0 : index
    %15 = vector.load %arg7[%c0_10, %c0_11] : memref<1x128xf32, #tpu.memory_space<vmem>>, vector<1x128xf32>
    tpu.vector_store %arg7[%c0_10, %c0_11], %14 {strides = array<i32>} : memref<1x128xf32, #tpu.memory_space<vmem>>, vector<1x128xf32>,
    %c0_i32_12 = arith.constant 0 : i32
    %16 = arith.cmpi eq, %arg1, %c0_i32_12 : i32
    %17 = arith.extui %16 : i1 to i32
    %c0_i32_13 = arith.constant 0 : i32
    %18 = arith.cmpi ne, %17, %c0_i32_13 : i32
    scf.if %18 {
      %c0_14 = arith.constant 0 : index
      %19 = memref.load %arg2[%c0_14] : memref<4xf32, #tpu.memory_space<smem>>
      %c1 = arith.constant 1 : index
      %20 = memref.load %arg2[%c1] : memref<4xf32, #tpu.memory_space<smem>>
      %c2 = arith.constant 2 : index
      %21 = memref.load %arg2[%c2] : memref<4xf32, #tpu.memory_space<smem>>
      %c3 = arith.constant 3 : index
      %22 = memref.load %arg2[%c3] : memref<4xf32, #tpu.memory_space<smem>>
      %c0_15 = arith.constant 0 : index
      %c0_16 = arith.constant 0 : index
      %23 = vector.load %arg3[%c0_15, %c0_16] : memref<16x128xf32, #tpu.memory_space<vmem>>, vector<16x128xf32>
      %24 = arith.mulf %23, %23 : vector<16x128xf32>
      %cst_17 = arith.constant dense<0.000000e+00> : vector<128xf32>
      %25 = vector.multi_reduction <add>, %24, %cst_17 [0] : vector<16x128xf32> to vector<128xf32>
      %26 = vector.shape_cast %25 : vector<128xf32> to vector<1x128xf32>
      %c0_18 = arith.constant 0 : index
      %c0_19 = arith.constant 0 : index
      %27 = vector.load %arg7[%c0_18, %c0_19] : memref<1x128xf32, #tpu.memory_space<vmem>>, vector<1x128xf32>
      %28 = arith.addf %27, %26 : vector<1x128xf32>
      %cst_20 = arith.constant 0.000000e+00 : f32
      %29 = vector.broadcast %cst_20 : f32 to vector<1x128xf32>
      %30 = arith.maximumf %28, %29 : vector<1x128xf32>
      %31 = math.sqrt %30 : vector<1x128xf32>
      %32 = arith.mulf %31, %31 : vector<1x128xf32>
      %33 = vector.broadcast %19 : f32 to vector<1x128xf32>
      %34 = arith.cmpf olt, %31, %33 : vector<1x128xf32>
      %35 = vector.broadcast %20 : f32 to vector<1x128xf32>
      %36 = arith.subf %32, %35 : vector<1x128xf32>
      %cst_21 = arith.constant 0.000000e+00 : f32
      %37 = arith.subf %cst_21, %20 : f32
      %38 = vector.broadcast %37 : f32 to vector<1x128xf32>
      %39 = arith.select %34, %36, %38 : vector<1x128xi1>, vector<1x128xf32>
      %40 = vector.broadcast %21 : f32 to vector<1x128xf32>
      %41 = arith.divf %40, %39 : vector<1x128xf32>
      %42 = vector.broadcast %22 : f32 to vector<1x128xf32>
      %43 = arith.addf %41, %42 : vector<1x128xf32>
      %44 = math.exp %43 : vector<1x128xf32>
      %cst_22 = arith.constant 0.000000e+00 : f32
      %45 = vector.broadcast %cst_22 : f32 to vector<1x128xf32>
      %46 = arith.select %34, %44, %45 : vector<1x128xi1>, vector<1x128xf32>
      %c0_23 = arith.constant 0 : index
      %c0_24 = arith.constant 0 : index
      %47 = vector.load %arg6[%c0_23, %c0_24] : memref<1x128xf32, #tpu.memory_space<vmem>>, vector<1x128xf32>
      tpu.vector_store %arg6[%c0_23, %c0_24], %46 {strides = array<i32>} : memref<1x128xf32, #tpu.memory_space<vmem>>, vector<1x128xf32>,
    } else {
    }
    return
  }
  func.func @transform_0(%arg0: i32, %arg1: i32) -> i32 {
    %c0_i32 = arith.constant 0 : i32
    %c0_i32_0 = arith.constant 0 : i32
    return %c0_i32 : i32
  }
  func.func @transform_1(%arg0: i32, %arg1: i32) -> (i32, i32) {
    %c0_i32 = arith.constant 0 : i32
    %c0_i32_0 = arith.constant 0 : i32
    return %c0_i32, %arg0 : i32, i32
  }
  func.func @transform_2(%arg0: i32, %arg1: i32) -> (i32, i32) {
    %c0_i32 = arith.constant 0 : i32
    %c0_i32_0 = arith.constant 0 : i32
    return %arg1, %c0_i32 : i32, i32
  }
  func.func @transform_3(%arg0: i32, %arg1: i32) -> (i32, i32) {
    %c0_i32 = arith.constant 0 : i32
    %c0_i32_0 = arith.constant 0 : i32
    return %arg1, %c0_i32 : i32, i32
  }
  func.func @transform_4(%arg0: i32, %arg1: i32) -> (i32, i32) {
    %c0_i32 = arith.constant 0 : i32
    %c0_i32_0 = arith.constant 0 : i32
    return %c0_i32, %arg0 : i32, i32
  }
}

</mosaic_0001>

<bundles_post_ra>
// kernel: tpu_custom_call.1
= control target key start
LH: loop header
LB: loop body
LE: loop exit
PB: predicated region body
PF: predicated region fallthrough
CT: control target
= control target key end

     0   :  { %9 = vsyncpa [#allocation5], 0  ;;  %s526_s0 = inlined_call_operand.vmem [shape: f32[4], index: 0, kind: input, shape index: {}]   ;;  %s527_s1 = inlined_call_operand.vmem [shape: f32[16,128], index: 1, kind: input, shape index: {}]   ;;  %s528_s2 = inlined_call_operand.vmem [shape: f32[64,16], index: 2, kind: input, shape index: {}]   ;;  %s529_s3 = inlined_call_operand.vmem [shape: f32[64,1], index: 3, kind: input, shape index: {}]   ;;  %s530_s4 = inlined_call_operand.hbm [shape: f32[1,128], index: 4, kind: output, shape index: {}]  }
   0x1   :  { %10 = vsyncpa [#allocation4], 0  ;;  %s17_s17 = sshll.u32 %s526_s0, 4  ;;  %s18_s17 = int_to_ptr.vmem [resolvable:$true] %s17_s17 }
   0x2   :  { %s369_s18 = scalar_lea.vmem %s18_s17, 16  ;;  %p374_p1 = scmp.lt.s32.totalorder %s18_s17, %s18_s17 }
   0x3   :  { %p370_p0 = scmp.ne.s32.totalorder %s18_s17, %s369_s18  ;;  %p375_p2 = scmp.lt.s32.totalorder %s369_s18, %s369_s18 }
   0x5   :  { %p376_p3 = por %p375_p2, %p374_p1 }
   0x7   :  { %p377_p4 = pnand %p376_p3, %p370_p0 }
   0x9   :  { %380 = shalt.err (!%p377_p4)
}
   0xa   :  { %s405_s19 = smov [#allocation3]  }
   0xb   :  { %20 = dma.vmem_to_smem %s18_s17, 16, %s405_s19, [#allocation5]  }
   0xc   :  { %401 = dma.done.wait [#allocation5], 16  }
   0xd   :  { %402 = vsyncadd [#allocation5], 4294967280 }
   0xe   :  { %30 = sfence }
   0xf   :  { %v440_v0 = vld [vmem:[%s527_s1 + $0x8] sm:$0xff]  ;;  %v445_v1 = vld [vmem:[%s527_s1] sm:$0xff]  ;;  %vm46_vm0 = vcmask 130048   ;;  %v38_v6 = vld [vmem:[%s528_s2 + $0x10] sm:$0xff]  ;;  %v406_v12 = vmov 0   ;;  %v407_v19 = vmov inf  }
  0x10   :  { %337 = vmatprep.subr.mxu0 %v440_v0  ;;  %353 = vmatprep.subr.mxu1 %v440_v0  ;;  %v36_v2 = vld [vmem:[%s528_s2] sm:$0xff]  ;;  %v37_v4 = vld [vmem:[%s528_s2 + $0x8] sm:$0xff]  ;;  %v42_v7 = vld [vmem:[%s528_s2 + $0x30] sm:$0xff]  ;;  %35 = vst [vmem:[#allocation2] sm:$0x1] %v407_v19  ;;  %v265_v43 = vmul.f32 %v445_v1, %v445_v1  ;;  %v266_v44 = vmul.f32 %v440_v0, %v440_v0  ;;  %s259_s26 = sld [smem:[#allocation3]] }
  0x11   :  { %338 = vmatpush3.msra.mxu0 %v440_v0  ;;  %355 = vmatpush3.msra.mxu1 %v440_v0  ;;  %v40_v3 = vld [vmem:[%s528_s2 + $0x20] sm:$0xff]  ;;  %v41_v5 = vld [vmem:[%s528_s2 + $0x28] sm:$0xff]  ;;  %v178_v8 = vld [vmem:[%s529_s3 + $0x10] sm:$0xff]  ;;  %s325_s27 = sld [smem:[#allocation3 + $0x2]]  ;;  %s408_s29 = smov [#allocation6]  }
  0x12   :  { %339 = vmatprep.subr.mxu0 %v445_v1  ;;  %354 = vmatprep.subr.mxu1 %v445_v1  ;;  %v176_v9 = vld [vmem:[%s529_s3] sm:$0xff]  ;;  %v39_v10 = vld [vmem:[%s528_s2 + $0x18] sm:$0xff]  ;;  %v177_v14 = vld [vmem:[%s529_s3 + $0x8] sm:$0xff]  ;;  %v267_v58 = vadd.f32 %v266_v44, %v265_v43  ;;  %s326_s28 = sld [smem:[#allocation3 + $0x3]]  ;;  %s307_s30 = sshll.u32 %s408_s29, 4  ;;  %s308_s30 = int_to_ptr.vmem [resolvable:$true] %s307_s30 }
  0x13   :  { %340 = vmatpush3.msra.mxu0 %v445_v1  ;;  %356 = vmatpush3.msra.mxu1 %v445_v1  ;;  %v43_v11 = vld [vmem:[%s528_s2 + $0x38] sm:$0xff]  ;;  %v181_v15 = vld [vmem:[%s529_s3 + $0x28] sm:$0xff]  ;;  %v180_v16 = vld [vmem:[%s529_s3 + $0x20] sm:$0xff]  ;;  %s381_s5 = scalar_lea.vmem %s308_s30, 16  ;;  %s385_s6 = scalar_lea.vmem %s308_s30, 32 }
  0x14   :  { %341 = vmatprep.mubr.msk.f32.mxu0 %vm46_vm0, %v36_v2  ;;  %347 = vmatprep.mubr.msk.f32.mxu1 %vm46_vm0, %v40_v3  ;;  %v179_v13 = vld [vmem:[%s529_s3 + $0x18] sm:$0xff]  ;;  %v182_v18 = vld [vmem:[%s529_s3 + $0x30] sm:$0xff]  ;;  %v268_v62 = vrot.slane %v267_v58, 4  ;;  %p382_p5 = scmp.ne.s32.totalorder %s308_s30, %s381_s5  ;;  %p386_p6 = scmp.lt.s32.totalorder %s308_s30, %s308_s30 }
  0x15   :  { %342 = vmatmul.mubr.msk.f32.vlgmr.msra.gmra.mxu0 %vm46_vm0, %v37_v4  ;;  %348 = vmatmul.mubr.msk.f32.vlgmr.msra.gmra.mxu1 %vm46_vm0, %v41_v5  ;;  %v183_v17 = vld [vmem:[%s529_s3 + $0x38] sm:$0xff]  ;;  %s324_s3 = sld [smem:[#allocation3 + $0x1]]  ;;  %p387_p7 = scmp.lt.s32.totalorder %s385_s6, %s381_s5 }
  0x16   :  { %344 = vmatprep.mubr.msk.f32.mxu0 %vm46_vm0, %v38_v6  ;;  %350 = vmatprep.mubr.msk.f32.mxu1 %vm46_vm0, %v42_v7  ;;  %v269_v1 = vadd.f32 %v268_v62, %v267_v58 }
  0x17   :  { %362 = vset.pattern.permute.xlu1 %v406_v12  ;;  %361 = vset.pattern.permute.xlu0 %v406_v12  ;;  %v240_v6 = vld [vmem:[#allocation2] sm:$0x1]  ;;  %p388_p8 = por %p387_p7, %p386_p6 }
  0x18   :  { %204 = vperm.xlu1 %362, %v178_v8   ;;  %194 = vperm.xlu0 %361, %v176_v9   ;;  %v270_v4 = vrot.slane %v269_v1, 2 }
  0x19   :  { %345 = vmatmul.mubr.msk.f32.gmra.mxu0 %vm46_vm0, %v39_v10  ;;  %351 = vmatmul.mubr.msk.f32.gmra.mxu1 %vm46_vm0, %v43_v11  ;;  %p389_p9 = pnand %p388_p8, %p382_p5 }
  0x1a   :  { %v271_v8 = vadd.f32 %v270_v4, %v269_v1 }
  0x1b   :  { %s289_s1 = ssub.f32 0.0, %s324_s3 }
  0x1c   :  { %209 = vperm.xlu1 %362, %v179_v13   ;;  %199 = vperm.xlu0 %361, %v177_v14   ;;  %v272_v10 = vrot.slane %v271_v8, 1 }
  0x1e   :  { %v273_v11 = vadd.f32 %v272_v10, %v271_v8 }
  0x20   :  { %219 = vperm.xlu1 %362, %v181_v15   ;;  %214 = vperm.xlu0 %361, %v180_v16  }
  0x24   :  { %229 = vperm.xlu1 %362, %v183_v17   ;;  %224 = vperm.xlu0 %361, %v182_v18  }
  0x93   :  { %v205_v20 = vpop.permute.xlu1 %204  ;;  %v195_v21 = vpop.permute.xlu0 %194 }
  0x97   :  { %v210_v22 = vpop.permute.xlu1 %209  ;;  %v200_v23 = vpop.permute.xlu0 %199 }
  0x9b   :  { %v220_v26 = vpop.permute.xlu1 %219  ;;  %v215_v27 = vpop.permute.xlu0 %214 }
  0x9f   :  { %v230_v45 = vpop.permute.xlu1 %229  ;;  %v225_v50 = vpop.permute.xlu0 %224 }
  0xd5   :  { %v343_v24 = vpop.f32.mrf.mxu0  ;;  %v349_v25 = vpop.f32.mrf.mxu1 }
  0xd6   :  { %v185_v28 = vmul.f32 2.0, %v343_v24  ;;  %v189_v31 = vmul.f32 2.0, %v349_v25 }
  0xd7   :  { %v137_v29 = vpop.f32.mrf.mxu0  ;;  %v157_v30 = vpop.f32.mrf.mxu1 }
  0xd8   :  { %v184_v32 = vmul.f32 2.0, %v137_v29  ;;  %v188_v33 = vmul.f32 2.0, %v157_v30  ;;  %v233_v39 = vsub.f32 %v200_v23, %v185_v28  ;;  %v237_v46 = vsub.f32 %v220_v26, %v189_v31 }
  0xd9   :  { %v346_v34 = vpop.f32.mrf.mxu0  ;;  %v352_v35 = vpop.f32.mrf.mxu1  ;;  %v290_v23 = vstv %s289_s1  ;;  %v295_v29 = vstv %s326_s28 }
  0xda   :  { %v232_v36 = vsub.f32 %v195_v21, %v184_v32  ;;  %v236_v37 = vsub.f32 %v215_v27, %v188_v33  ;;  %v187_v38 = vmul.f32 2.0, %v346_v34  ;;  %v191_v40 = vmul.f32 2.0, %v352_v35 }
  0xdb   :  { %v147_v41 = vpop.f32.mrf.mxu0  ;;  %v167_v42 = vpop.f32.mrf.mxu1  ;;  %v242_v55 = vmin.f32 %v233_v39, %v237_v46  ;;  %v292_v27 = vstv %s325_s27 }
  0xdc   :  { %v235_v47 = vsub.f32 %v210_v22, %v187_v38  ;;  %v186_v48 = vmul.f32 2.0, %v147_v41  ;;  %v190_v49 = vmul.f32 2.0, %v167_v42  ;;  %v239_v51 = vsub.f32 %v230_v45, %v191_v40 }
  0xdd   :  { %v241_v52 = vmin.f32 %v232_v36, %v236_v37  ;;  %v285_v22 = vstv %s259_s26 }
  0xde   :  { %v234_v53 = vsub.f32 %v205_v20, %v186_v48  ;;  %v238_v54 = vsub.f32 %v225_v50, %v190_v49  ;;  %v244_v56 = vmin.f32 %v235_v47, %v239_v51  ;;  %v287_v20 = vstv %s324_s3 }
  0xdf   :  { %v245_v59 = vmin.f32 %v241_v52, %v242_v55 }
  0xe0   :  { %v243_v57 = vmin.f32 %v234_v53, %v238_v54 }
  0xe2   :  { %v246_v60 = vmin.f32 %v243_v57, %v244_v56 }
  0xe4   :  { %v247_v61 = vmin.f32 %v245_v59, %v246_v60 }
  0xe6   :  { %v248_v63 = vrot.slane %v247_v61, 4 }
  0xe8   :  { %v249_v0 = vmin.f32 %v247_v61, %v248_v63 }
  0xea   :  { %v250_v2 = vrot.slane %v249_v0, 2 }
  0xec   :  { %v251_v3 = vmin.f32 %v249_v0, %v250_v2 }
  0xee   :  { %v252_v5 = vrot.slane %v251_v3, 1 }
  0xf0   :  { %v253_v7 = vmin.f32 %v251_v3, %v252_v5 }
  0xf2   :  { %v254_v9 = vmin.f32 %v240_v6, %v253_v7 }
  0xf4   :  { %255 = vst [vmem:[#allocation2] sm:$0x1] %v254_v9 }
  0xfb   :  { %v274_v12 = vld [vmem:[#allocation2] sm:$0x1] }
  0xfc   :  { %v275_v13 = vadd.f32 %v274_v12, %v273_v11 }
  0xfe   :  { %v276_v14 = vmax.f32 %v275_v13, 0.0 }
 0x100   :  { %363 = vrsqrt.f32 %v276_v14  ;;  %vm279_vm1 = vcmp.eq.f32.partialorder %v276_v14, inf  ;;  %v282_v17 = vand.u32 2147483648, %v276_v14  ;;  %vm281_vm2 = vcmp.eq.f32.partialorder %v276_v14, 0.0 }
 0x10d   :  { %v364_v15 = vpop.eup %363 }
 0x10e   :  { %v278_v16 = vmul.f32 %v364_v15, %v276_v14 }
 0x110   :  { %v280_v18 = vsel %vm279_vm1, %v276_v14, %v278_v16 }
 0x111   :  { %v283_v19 = vsel %vm281_vm2, %v282_v17, %v280_v18 }
 0x112   :  { %v284_v21 = vmul.f32 %v283_v19, %v283_v19  ;;  %vm515_vm3 = vcmp.lt.f32.partialorder %v283_v19, %v285_v22 }
 0x114   :  { %v288_v24 = vsub.f32 %v284_v21, %v287_v20 }
 0x116   :  { %v291_v26 = vsel %vm515_vm3, %v288_v24, %v290_v23 }
 0x117   :  { %365 = vrcp.f32 %v291_v26 }
 0x124   :  { %v366_v28 = vpop.eup %365 }
 0x125   :  { %v294_v30 = vmul.f32 %v366_v28, %v292_v27 }
 0x127   :  { %v296_v31 = vadd.f32 %v295_v29, %v294_v30 }
 0x129   :  { %v297_v32 = vmul.f32 1.442695, %v296_v31 }
 0x12b   :  { %367 = vpow2.f32 %v297_v32 }
 0x138   :  { %v368_v33 = vpop.eup %367 }
 0x139   :  { %v299_v34 = vsel %vm515_vm3, %v368_v33, 0.0 }
 0x13a   :  { %300 = vst [vmem:[#allocation6] sm:$0x1] %v299_v34 }
 0x13b   :  { %392 = shalt.err (!%p389_p9)
}
 0x13c   :  { %310 = dma.vmem_to_hbm [thread:$0]  %s308_s30, 16, %s530_s4, [#allocation4]  }
 0x13d   :  { %403 = dma.done.wait [#allocation4], 16  }
 0x13e   :  { %404 = vsyncadd [#allocation4], 4294967280 }
 0x13f   :  { %314 = vsyncpa [#allocation4], 1 }
 0x140   :  { %315 = vsyncpa [#allocation5], 1 }

</bundles_post_ra>
